<compile_context>
chip_gen: v7x
topology: tpu7x:2x2x1
jax: 0.10.0
libtpu: 0.0.40
codegen_flags: <defaults>
</compile_context>

<pallas_src>
import functools
import math

import jax
import jax.numpy as jnp
from jax.experimental import pallas as pl
from jax.experimental.pallas import tpu as pltpu


# ----------------------------- in-kernel helpers ----------------------------

def _ln(x, g, b, eps=1e-5):
    # row-wise LayerNorm over last dim (f32 statistics), eps matches torch 1e-5
    mean = jnp.mean(x, axis=-1, keepdims=True)
    var = jnp.mean((x - mean) ** 2, axis=-1, keepdims=True)
    return (x - mean) * jax.lax.rsqrt(var + eps) * g + b


# ----------------------------- Pallas kernels -------------------------------

def _patch_embed_kernel(p_ref, w_ref, b_ref, pos_ref, o_ref):
    # o[b] = patches[b] @ w + b + pos     (Conv3d-as-matmul fused with pos add)
    y = jnp.dot(p_ref[0], w_ref[...], preferred_element_type=jnp.float32)
    o_ref[0] = (y + b_ref[...] + pos_ref[...]).astype(o_ref.dtype)


def _block_kernel(x_ref, ln1g_ref, ln1b_ref, qkvw_ref, projw_ref, projb_ref,
                  ln2g_ref, ln2b_ref, fc1w_ref, fc1b_ref, fc2w_ref, fc2b_ref,
                  o_ref, *, num_heads, scale):
    # Full pre-norm ViT block for one batch element, entirely in VMEM:
    #   x = x + proj(attn(LN1(x)));  x = x + fc2(gelu(fc1(LN2(x))))
    x = x_ref[0].astype(jnp.float32)                       # (N, E)
    n_tok, dim = x.shape
    dh = dim // num_heads

    # --- attention branch ---
    h = _ln(x, ln1g_ref[...], ln1b_ref[...])
    # qkv_bias=False -> no bias add
    qkv = jnp.dot(h, qkvw_ref[...], preferred_element_type=jnp.float32)  # (N, 3E)

    head_outs = []
    for hd in range(num_heads):                            # unrolled, static slices
        lo = hd * dh
        qh = qkv[:, lo:lo + dh]
        kh = qkv[:, dim + lo:dim + lo + dh]
        vh = qkv[:, 2 * dim + lo:2 * dim + lo + dh]
        s = jax.lax.dot_general(qh, kh, (((1,), (1,)), ((), ())),
                                preferred_element_type=jnp.float32) * scale
        s = s - jnp.max(s, axis=-1, keepdims=True)
        p = jnp.exp(s)
        p = p * pl.reciprocal(jnp.sum(p, axis=-1, keepdims=True), approx=True)
        head_outs.append(jnp.dot(p, vh, preferred_element_type=jnp.float32))
    attn = jnp.concatenate(head_outs, axis=-1)             # (N, E), lane-dense
    x = x + jnp.dot(attn, projw_ref[...],
                    preferred_element_type=jnp.float32) + projb_ref[...]

    # --- MLP branch ---
    h = _ln(x, ln2g_ref[...], ln2b_ref[...])
    h = jnp.dot(h, fc1w_ref[...], preferred_element_type=jnp.float32) + fc1b_ref[...]
    h = jax.nn.gelu(h, approximate=False)                  # exact erf GELU (torch default)
    x = x + jnp.dot(h, fc2w_ref[...],
                    preferred_element_type=jnp.float32) + fc2b_ref[...]

    o_ref[0] = x.astype(o_ref.dtype)


def _layernorm_kernel(x_ref, g_ref, b_ref, o_ref):
    x = x_ref[...].astype(jnp.float32)
    o_ref[...] = _ln(x, g_ref[...], b_ref[...]).astype(o_ref.dtype)


# ----------------------------- kernel wrappers ------------------------------

def patch_embed(patches, w, b, pos):
    # patches: (B, N, K), w: (K, E), b: (E,), pos: (N, E) -> (B, N, E)
    B, N, K = patches.shape
    E = w.shape[1]
    return pl.pallas_call(
        _patch_embed_kernel,
        grid=(B,),
        in_specs=[
            pl.BlockSpec((1, N, K), lambda i: (i, 0, 0)),
            pl.BlockSpec((K, E), lambda i: (0, 0)),
            pl.BlockSpec((1, E), lambda i: (0, 0)),
            pl.BlockSpec((N, E), lambda i: (0, 0)),   # pos reused for every batch
        ],
        out_specs=pl.BlockSpec((1, N, E), lambda i: (i, 0, 0)),
        out_shape=jax.ShapeDtypeStruct((B, N, E), patches.dtype),
        compiler_params=pltpu.CompilerParams(dimension_semantics=("parallel",)),
    )(patches, w, b.reshape(1, E), pos)


def transformer_block(x, p, num_heads):
    # x: (B, N, E); one fused pallas_call per block, grid over batch.
    B, N, E = x.shape
    Hd = p["fc1_w"].shape[1]
    scale = (E // num_heads) ** -0.5
    kern = functools.partial(_block_kernel, num_heads=num_heads, scale=scale)

    def full2(shape):
        return pl.BlockSpec(shape, lambda i: (0, 0))

    return pl.pallas_call(
        kern,
        grid=(B,),
        in_specs=[
            pl.BlockSpec((1, N, E), lambda i: (i, 0, 0)),   # x
            full2((1, E)), full2((1, E)),                   # ln1 gamma / beta
            full2((E, 3 * E)),                              # qkv weight (no bias)
            full2((E, E)), full2((1, E)),                   # proj weight / bias
            full2((1, E)), full2((1, E)),                   # ln2 gamma / beta
            full2((E, Hd)), full2((1, Hd)),                 # fc1 weight / bias
            full2((Hd, E)), full2((1, E)),                  # fc2 weight / bias
        ],
        out_specs=pl.BlockSpec((1, N, E), lambda i: (i, 0, 0)),
        out_shape=jax.ShapeDtypeStruct((B, N, E), x.dtype),
        compiler_params=pltpu.CompilerParams(dimension_semantics=("parallel",)),
    )(x,
      p["ln1_g"].reshape(1, E), p["ln1_b"].reshape(1, E),
      p["qkv_w"],
      p["proj_w"], p["proj_b"].reshape(1, E),
      p["ln2_g"].reshape(1, E), p["ln2_b"].reshape(1, E),
      p["fc1_w"], p["fc1_b"].reshape(1, Hd),
      p["fc2_w"], p["fc2_b"].reshape(1, E))


def _row_tile(m):
    # largest row tile that divides m, is a multiple of 8 and gives >= 2 blocks
    if m % 8 != 0:
        return m
    for t in (512, 256, 128, 64, 32, 16, 8):
        if t <= m // 2 and m % t == 0:
            return t
    return m


def layernorm(x, g, b):
    # x: (M, E) -> (M, E); gridded over row tiles so DMA pipelines with compute
    M, E = x.shape
    tm = _row_tile(M)
    return pl.pallas_call(
        _layernorm_kernel,
        grid=(M // tm,),
        in_specs=[
            pl.BlockSpec((tm, E), lambda i: (i, 0)),
            pl.BlockSpec((1, E), lambda i: (0, 0)),
            pl.BlockSpec((1, E), lambda i: (0, 0)),
        ],
        out_specs=pl.BlockSpec((tm, E), lambda i: (i, 0)),
        out_shape=jax.ShapeDtypeStruct((M, E), x.dtype),
        compiler_params=pltpu.CompilerParams(dimension_semantics=("parallel",)),
    )(x, g.reshape(1, E), b.reshape(1, E))


# ----------------------------- model pieces (glue) --------------------------

def extract_patches_3d(x, patch_size, stride):
    # x: (B, C, D, H, W)  ->  (B, num_patches, C*ps^3), im2col for Conv3d
    B, C, D, H, W = x.shape
    ps, st = patch_size, stride
    nd = (D - ps) // st + 1
    nh = (H - ps) // st + 1
    nw = (W - ps) // st + 1
    if st == ps and D % ps == 0 and H % ps == 0 and W % ps == 0:
        # non-overlapping patches: single reshape + transpose (one fused XLA op)
        p = x.reshape(B, C, nd, ps, nh, ps, nw, ps)
        p = p.transpose(0, 2, 4, 6, 1, 3, 5, 7)   # (B, nd, nh, nw, C, pd, ph, pw)
        return p.reshape(B, nd * nh * nw, C * ps ** 3)
    # TODO(synk): overlapping patches (stride < patch_size) still use an
    # unrolled slice loop; a DMA-gather Pallas kernel is needed at volume scale.
    patches = []
    for i in range(nd):
        for j in range(nh):
            for k in range(nw):
                blk = x[:, :, i * st:i * st + ps,
                           j * st:j * st + ps,
                           k * st:k * st + ps]
                patches.append(blk.reshape(B, -1))
    return jnp.stack(patches, axis=1)


def sincos_pos_embedding(num_patches, dim):
    pos = jnp.arange(num_patches, dtype=jnp.float32)[:, None]
    div = jnp.exp(jnp.arange(0, dim, 2, dtype=jnp.float32)
                  * (-math.log(10000.0) / dim))
    pe = jnp.zeros((num_patches, dim), dtype=jnp.float32)
    pe = pe.at[:, 0::2].set(jnp.sin(pos * div))
    pe = pe.at[:, 1::2].set(jnp.cos(pos * div))
    return pe


def xavier_uniform(key, fan_in, fan_out):
    bound = math.sqrt(6.0 / (fan_in + fan_out))
    return jax.random.uniform(key, (fan_in, fan_out), jnp.float32, -bound, bound)


def init_params(key, cfg):
    E = cfg["embed_dim"]
    K = cfg["n_channel"] * cfg["patch_size"] ** 3
    Hd = int(cfg["mlp_hidden_dim"])
    keys = jax.random.split(key, 1 + 4 * cfg["depth"])
    ki = iter(keys)
    params = {
        # Conv3d patch-embed as a (K, E) projection + bias
        "patch_w": xavier_uniform(next(ki), K, E),
        "patch_b": jnp.zeros((E,), jnp.float32),
        "pos": sincos_pos_embedding(cfg["num_patches"], E),
        "norm_g": jnp.ones((E,), jnp.float32),
        "norm_b": jnp.zeros((E,), jnp.float32),
        "blocks": [],
    }
    for _ in range(cfg["depth"]):
        blk = {
            "ln1_g": jnp.ones((E,), jnp.float32),
            "ln1_b": jnp.zeros((E,), jnp.float32),
            "qkv_w": xavier_uniform(next(ki), E, 3 * E),   # qkv_bias=False
            "proj_w": xavier_uniform(next(ki), E, E),
            "proj_b": jnp.zeros((E,), jnp.float32),
            "ln2_g": jnp.ones((E,), jnp.float32),
            "ln2_b": jnp.zeros((E,), jnp.float32),
            "fc1_w": xavier_uniform(next(ki), E, Hd),
            "fc1_b": jnp.zeros((Hd,), jnp.float32),
            "fc2_w": xavier_uniform(next(ki), Hd, E),
            "fc2_b": jnp.zeros((E,), jnp.float32),
        }
        params["blocks"].append(blk)
    return params


def vit_encoder_forward(x, params, cfg):
    # x is (B, C, D, H, W)  (PyTorch NCDHW layout)
    B = x.shape[0]
    E = cfg["embed_dim"]
    patches = extract_patches_3d(x, cfg["patch_size"], cfg["patch_strides"])
    _, N, _ = patches.shape
    # patch embedding (Conv3d-as-matmul) fused with sin/cos pos-embedding add
    h = patch_embed(patches, params["patch_w"], params["patch_b"], params["pos"])
    for blk in params["blocks"]:
        h = transformer_block(h, blk, cfg["num_heads"])
    out = layernorm(h.reshape(B * N, E), params["norm_g"], params["norm_b"])
    out = out.reshape(B, N, E)
    if cfg["expand_channel_dim"]:
        out = out[:, None]          # torch.unsqueeze(emb, 1)
    return out
    # NOTE: drop_rate / attn_drop_rate = 0.0 and init_values=0.0 (no layer
    # scale), so dropout and layer-scale are identities and are omitted.
    # TODO(synk): the fused block holds the full (N, N) score matrix per head;
    # a flash-style online softmax is needed before scaling N to thousands.


# ---------------------------------- main ------------------------------------

if __name__ == "__main__":
    cfg = dict(
        img_size=[16, 16, 16],
        patch_size=8,
        patch_strides=8,
        embed_dim=64,
        depth=2,
        num_heads=4,
        mlp_hidden_dim=128.0,
        n_channel=1,
        expand_channel_dim=False,
    )
    cfg["num_patches"] = (
        ((cfg["img_size"][0] - cfg["patch_size"]) // cfg["patch_strides"] + 1)
        * ((cfg["img_size"][1] - cfg["patch_size"]) // cfg["patch_strides"] + 1)
        * ((cfg["img_size"][2] - cfg["patch_size"]) // cfg["patch_strides"] + 1)
    )

    key = jax.random.PRNGKey(0)
    kx, kp = jax.random.split(key)
    B = 2
    x = jax.random.normal(
        kx, (B, cfg["n_channel"], *cfg["img_size"]), dtype=jnp.float32)
    params = init_params(kp, cfg)

    out = vit_encoder_forward(x, params, cfg)
    out = jax.block_until_ready(out)
    assert out.shape == (B, cfg["num_patches"], cfg["embed_dim"]), out.shape
    assert jnp.all(jnp.isfinite(out))
    print("KERNEL_OK")
</pallas_src>

<mosaic_0001>
module attributes {stable_mosaic.version = 11 : i64} {
  func.func @_patch_embed_kernel(%arg0: i32, %arg1: memref<1x8x512xf32, #tpu.memory_space<vmem>>, %arg2: memref<512x64xf32, #tpu.memory_space<vmem>>, %arg3: memref<1x64xf32, #tpu.memory_space<vmem>>, %arg4: memref<8x64xf32, #tpu.memory_space<vmem>>, %arg5: memref<1x8x64xf32, #tpu.memory_space<vmem>>) attributes {dimension_semantics = [#tpu.dimension_semantics<parallel>], iteration_bounds = array<i64: 2>, scalar_prefetch = 0 : i64, scratch_operands = 0 : i64, tpu.core_type = #tpu.core_type<tc>, window_params = [{transform_indices = @transform_0, window_bounds = array<i64: 1, 8, 512>}, {pipeline_mode = #tpu.pipeline_mode<synchronous>, transform_indices = @transform_1, window_bounds = array<i64: 512, 64>}, {pipeline_mode = #tpu.pipeline_mode<synchronous>, transform_indices = @transform_2, window_bounds = array<i64: 1, 64>}, {pipeline_mode = #tpu.pipeline_mode<synchronous>, transform_indices = @transform_3, window_bounds = array<i64: 8, 64>}, {transform_indices = @transform_4, window_bounds = array<i64: 1, 8, 64>}]} {
    %c0 = arith.constant 0 : index
    %c0_0 = arith.constant 0 : index
    %c0_1 = arith.constant 0 : index
    %0 = vector.load %arg1[%c0, %c0_0, %c0_1] : memref<1x8x512xf32, #tpu.memory_space<vmem>>, vector<1x8x512xf32>
    %1 = vector.shape_cast %0 : vector<1x8x512xf32> to vector<8x512xf32>
    %c0_2 = arith.constant 0 : index
    %c0_3 = arith.constant 0 : index
    %2 = vector.load %arg2[%c0_2, %c0_3] : memref<512x64xf32, #tpu.memory_space<vmem>>, vector<512x64xf32>
    %cst = arith.constant dense<0.000000e+00> : vector<8x64xf32>
    %3 = tpu.matmul %1, %2, %cst {dimension_numbers = #tpu.dot_dimension_numbers<[1], [0], [0], [1], [0, 0, 1, 1], [], []>} : vector<8x512xf32>, vector<512x64xf32>, vector<8x64xf32> -> vector<8x64xf32>
    %c0_4 = arith.constant 0 : index
    %c0_5 = arith.constant 0 : index
    %4 = vector.load %arg3[%c0_4, %c0_5] : memref<1x64xf32, #tpu.memory_space<vmem>>, vector<1x64xf32>
    %5 = vector.broadcast %4 : vector<1x64xf32> to vector<8x64xf32>
    %6 = arith.addf %3, %5 : vector<8x64xf32>
    %c0_6 = arith.constant 0 : index
    %c0_7 = arith.constant 0 : index
    %7 = vector.load %arg4[%c0_6, %c0_7] : memref<8x64xf32, #tpu.memory_space<vmem>>, vector<8x64xf32>
    %8 = arith.addf %6, %7 : vector<8x64xf32>
    %c0_8 = arith.constant 0 : index
    %c0_9 = arith.constant 0 : index
    %c0_10 = arith.constant 0 : index
    %9 = vector.load %arg5[%c0_8, %c0_9, %c0_10] : memref<1x8x64xf32, #tpu.memory_space<vmem>>, vector<1x8x64xf32>
    %10 = vector.shape_cast %9 : vector<1x8x64xf32> to vector<8x64xf32>
    %11 = vector.shape_cast %8 : vector<8x64xf32> to vector<1x8x64xf32>
    tpu.vector_store %arg5[%c0_8, %c0_9, %c0_10], %11 {strides = array<i32>} : memref<1x8x64xf32, #tpu.memory_space<vmem>>, vector<1x8x64xf32>,
    return
  }
  func.func @transform_0(%arg0: i32) -> (i32, i32, i32) {
    %c0_i32 = arith.constant 0 : i32
    %c0_i32_0 = arith.constant 0 : i32
    %c0_i32_1 = arith.constant 0 : i32
    return %arg0, %c0_i32, %c0_i32_0 : i32, i32, i32
  }
  func.func @transform_1(%arg0: i32) -> (i32, i32) {
    %c0_i32 = arith.constant 0 : i32
    %c0_i32_0 = arith.constant 0 : i32
    %c0_i32_1 = arith.constant 0 : i32
    return %c0_i32, %c0_i32_0 : i32, i32
  }
  func.func @transform_2(%arg0: i32) -> (i32, i32) {
    %c0_i32 = arith.constant 0 : i32
    %c0_i32_0 = arith.constant 0 : i32
    %c0_i32_1 = arith.constant 0 : i32
    return %c0_i32, %c0_i32_0 : i32, i32
  }
  func.func @transform_3(%arg0: i32) -> (i32, i32) {
    %c0_i32 = arith.constant 0 : i32
    %c0_i32_0 = arith.constant 0 : i32
    %c0_i32_1 = arith.constant 0 : i32
    return %c0_i32, %c0_i32_0 : i32, i32
  }
  func.func @transform_4(%arg0: i32) -> (i32, i32, i32) {
    %c0_i32 = arith.constant 0 : i32
    %c0_i32_0 = arith.constant 0 : i32
    %c0_i32_1 = arith.constant 0 : i32
    return %arg0, %c0_i32, %c0_i32_0 : i32, i32, i32
  }
}

</mosaic_0001>

<bundles_post_ra>
// kernel: tpu_custom_call.1
= control target key start
LH: loop header
LB: loop body
LE: loop exit
PB: predicated region body
PF: predicated region fallthrough
CT: control target
= control target key end

     0   :  { %9 = vsyncpa [#allocation3], 0  ;;  %s1073_s0 = inlined_call_operand.vmem [shape: f32[2,8,512], index: 0, kind: input, shape index: {}]   ;;  %s1074_s1 = inlined_call_operand.vmem [shape: f32[512,64], index: 1, kind: input, shape index: {}]   ;;  %s1075_s2 = inlined_call_operand.vmem [shape: f32[1,64], index: 2, kind: input, shape index: {}]   ;;  %s1076_s3 = inlined_call_operand.vmem [shape: f32[8,64], index: 3, kind: input, shape index: {}]   ;;  %s1077_s4 = inlined_call_operand.hbm [shape: f32[2,8,64], index: 4, kind: output, shape index: {}]  }
   0x1   :  { %11 = vsyncpa [#allocation3 + $0x1], 0  ;;  %s764_s15 = smov 0   ;;  %s766_s16 = smov 0  }
   0x2   :  { %s768_s17 = smov 0   ;;  %s770_s18 = smov 0  }
   0x3 LB: > { %s785_s19 = sadd.s32 4294967295, %s736_s18   ;;  %s488_s20 = sadd.s32 4294967294, %s736_s18   ;;  %s736_s18 = sphi %s770_s18, %s1083_s18   ;;  %s732_s17 = sphi %s768_s17, %s1082_s17   ;;  %s728_s16 = sphi %s766_s16, %s1081_s16   ;;  %s724_s15 = sphi %s764_s15, %s1080_s15  }
   0x4   : > { %s789_s21 = sadd.s32 1, %s736_s18   ;;  %s113_s22 = sadd.s32 1, %s732_s17 }
   0x5   : > { %s110_s23 = ssub.s32 %s736_s18, %s789_s21  ;;  %p123_p0 = scmp.ne.s32.totalorder %s732_s17, %s728_s16 }
   0x6   : > { %p111_p1 = scmp.eq.s32.totalorder %s110_s23, 0  ;;  %p124_p2 = scmp.eq.s32.totalorder %s785_s19, 1 }
   0x7   : > { %p129_p3 = scmp.ne.s32.totalorder %s728_s16, %s724_s15  ;;  %p130_p4 = scmp.eq.s32.totalorder %s488_s20, 1 }
   0x8   : > { %s800_s24 = scalar_select %p111_p1, %s732_s17, %s113_s22  }
   0x9   : > { %p802_p5 = por %p124_p2, %p123_p0  ;;  %p806_p6 = por %p130_p4, %p129_p3 }
   0xa   : > { %p491_p7 = scmp.ge.s32.totalorder %s736_s18, 1  ;;  %p165_p8 = scmp.lt.s32.totalorder %s736_s18, 3 }
   0xc   : > { %p166_p9 = pnand %p491_p7, %p165_p8 }
   0xd   : > { %v216_v0 = vld [vmem:[%s1074_s1 + $0x80] sm:$0xff] (!%p166_p9)  ;;  %v217_v1 = vld [vmem:[%s1074_s1 + $0x88] sm:$0xff] (!%p166_p9)  ;;  %v218_v11 = vld [vmem:[%s1074_s1 + $0x90] sm:$0xff] (!%p166_p9)  ;;  %p191_p10 = scmp.lt.s32.totalorder (!%p166_p9), %s785_s19, 1  ;;  %s188_s22 = sand.u32 (!%p166_p9), 1, %s728_s16   ;;  %vm413_vm0 = vcmask (!%p166_p9), 523264  }
   0xe   : > { %169 = sbr.rel (%p166_p9) target bundleno = 283 (0x11b), region = 36  ;;  %v200_v2 = vld [vmem:[%s1074_s1] sm:$0xff] (!%p166_p9)  ;;  %v571_v3 = vpack.c.bf16 (!%p166_p9), %v217_v1, %v216_v0  ;;  %v201_v4 = vld [vmem:[%s1074_s1 + $0x8] sm:$0xff] (!%p166_p9)  ;;  %v219_v13 = vld [vmem:[%s1074_s1 + $0x98] sm:$0xff] (!%p166_p9)  ;;  %s492_s23 = sshll.u32 (!%p166_p9), %s188_s22, 3 }
   0xf   : > { %v248_v5 = vld [vmem:[%s1074_s1 + $0x180] sm:$0xff] (!%p166_p9)  ;;  %v249_v6 = vld [vmem:[%s1074_s1 + $0x188] sm:$0xff] (!%p166_p9)  ;;  %v573_v7 = vpack.c.bf16 (!%p166_p9), %v201_v4, %v200_v2  ;;  %v202_v14 = vld [vmem:[%s1074_s1 + $0x10] sm:$0xff] (!%p166_p9)  ;;  %v575_v16 = vpack.c.bf16 (!%p166_p9), %v219_v13, %v218_v11  ;;  %s190_s8 = scalar_lea.vmem (!%p166_p9), [#allocation2], %s492_s23 }
  0x10   : > { %v603_v8 = vpack.c.bf16 (!%p166_p9), %v249_v6, %v248_v5  ;;  %v232_v9 = vld [vmem:[%s1074_s1 + $0x100] sm:$0xff] (!%p166_p9)  ;;  %v233_v10 = vld [vmem:[%s1074_s1 + $0x108] sm:$0xff] (!%p166_p9)  ;;  %572 = vmatprep.subr.bf16.mxu0 (!%p166_p9), %v571_v3  ;;  %v203_v15 = vld [vmem:[%s1074_s1 + $0x18] sm:$0xff] (!%p166_p9)  ;;  %s429_s9 = sshll.u32 (!%p166_p9), %s190_s8, 4  ;;  %s1033_s9 = int_to_ptr.vmem [resolvable:$true] %s429_s9 }
  0x11   : > { %v605_v12 = vpack.c.bf16 (!%p166_p9), %v233_v10, %v232_v9  ;;  %574 = vmatpush3.bf16.msra.mxu0 (!%p166_p9), %v573_v7  ;;  %v577_v17 = vpack.c.bf16 (!%p166_p9), %v203_v15, %v202_v14  ;;  %v250_v18 = vld [vmem:[%s1074_s1 + $0x190] sm:$0xff] (!%p166_p9)  ;;  %v251_v19 = vld [vmem:[%s1074_s1 + $0x198] sm:$0xff] (!%p166_p9)  ;;  %v220_v23 = vld [vmem:[%s1074_s1 + $0xa0] sm:$0xff] (!%p166_p9) }
  0x12   : > { %604 = vmatprep.subr.bf16.mxu1 (!%p166_p9), %v603_v8  ;;  %v234_v20 = vld [vmem:[%s1074_s1 + $0x110] sm:$0xff] (!%p166_p9)  ;;  %v607_v21 = vpack.c.bf16 (!%p166_p9), %v251_v19, %v250_v18  ;;  %v235_v22 = vld [vmem:[%s1074_s1 + $0x118] sm:$0xff] (!%p166_p9)  ;;  %v221_v24 = vld [vmem:[%s1074_s1 + $0xa8] sm:$0xff] (!%p166_p9)  ;;  %576 = vmatprep.subr.bf16.mxu0 (!%p166_p9), %v575_v16 }
  0x13   : > { %606 = vmatpush3.bf16.msra.mxu1 (!%p166_p9), %v605_v12  ;;  %v609_v25 = vpack.c.bf16 (!%p166_p9), %v235_v22, %v234_v20  ;;  %v579_v26 = vpack.c.bf16 (!%p166_p9), %v221_v24, %v220_v23  ;;  %v204_v27 = vld [vmem:[%s1074_s1 + $0x20] sm:$0xff] (!%p166_p9)  ;;  %v205_v28 = vld [vmem:[%s1074_s1 + $0x28] sm:$0xff] (!%p166_p9)  ;;  %v222_v35 = vld [vmem:[%s1074_s1 + $0xb0] sm:$0xff] (!%p166_p9) }
  0x14   : > { %v252_v29 = vld [vmem:[%s1074_s1 + $0x1a0] sm:$0xff] (!%p166_p9)  ;;  %608 = vmatprep.subr.bf16.mxu1 (!%p166_p9), %v607_v21  ;;  %v253_v30 = vld [vmem:[%s1074_s1 + $0x1a8] sm:$0xff] (!%p166_p9)  ;;  %v581_v33 = vpack.c.bf16 (!%p166_p9), %v205_v28, %v204_v27  ;;  %v223_v36 = vld [vmem:[%s1074_s1 + $0xb8] sm:$0xff] (!%p166_p9) }
  0x15   : > { %v236_v31 = vld [vmem:[%s1074_s1 + $0x120] sm:$0xff]  ;;  %v237_v32 = vld [vmem:[%s1074_s1 + $0x128] sm:$0xff]  ;;  %578 = vmatpush3.bf16.msra.mxu0 %v577_v17  ;;  %v611_v34 = vpack.c.bf16 %v253_v30, %v252_v29  ;;  %v206_v37 = vld [vmem:[%s1074_s1 + $0x30] sm:$0xff]  ;;  %v583_v39 = vpack.c.bf16 %v223_v36, %v222_v35  ;;  %s918_s27 = scalar_select %p191_p10, %s785_s19, 1 }
  0x16   : > { %580 = vmatprep.subr.bf16.mxu0 %v579_v26  ;;  %v613_v38 = vpack.c.bf16 %v237_v32, %v236_v31  ;;  %v207_v40 = vld [vmem:[%s1074_s1 + $0x38] sm:$0xff]  ;;  %v254_v41 = vld [vmem:[%s1074_s1 + $0x1b0] sm:$0xff]  ;;  %v224_v46 = vld [vmem:[%s1074_s1 + $0xc0] sm:$0xff] }
  0x17   : > { %610 = vmatpush3.bf16.msra.mxu1 %v609_v25  ;;  %v255_v42 = vld [vmem:[%s1074_s1 + $0x1b8] sm:$0xff]  ;;  %v238_v44 = vld [vmem:[%s1074_s1 + $0x130] sm:$0xff]  ;;  %v225_v47 = vld [vmem:[%s1074_s1 + $0xc8] sm:$0xff]  ;;  %v585_v48 = vpack.c.bf16 %v207_v40, %v206_v37  ;;  %s500_s6 = sshll.u32 %s918_s27, 5  ;;  %s416_s27 = scalar_lea.sflag [#allocation3], %s188_s22 }
  0x18   : > { %612 = vmatprep.subr.bf16.mxu1 %v611_v34  ;;  %v615_v43 = vpack.c.bf16 %v255_v42, %v254_v41  ;;  %v239_v45 = vld [vmem:[%s1074_s1 + $0x138] sm:$0xff]  ;;  %v256_v49 = vld [vmem:[%s1074_s1 + $0x1c0] sm:$0xff]  ;;  %v257_v50 = vld [vmem:[%s1074_s1 + $0x1c8] sm:$0xff]  ;;  %v587_v52 = vpack.c.bf16 %v225_v47, %v224_v46  ;;  %s972_s30 = scalar_lea.vmem %s1073_s0, %s500_s6  ;;  %s674_s6 = scalar_lea.vmem %s1033_s9, 128 }
  0x19   : > { %582 = vmatpush3.bf16.msra.mxu0 %v581_v33  ;;  %v617_v51 = vpack.c.bf16 %v239_v45, %v238_v44  ;;  %v208_v53 = vld [vmem:[%s1074_s1 + $0x40] sm:$0xff]  ;;  %v209_v54 = vld [vmem:[%s1074_s1 + $0x48] sm:$0xff]  ;;  %v619_v56 = vpack.c.bf16 %v257_v50, %v256_v49  ;;  %v226_v58 = vld [vmem:[%s1074_s1 + $0xd0] sm:$0xff]  ;;  %p675_p11 = scmp.ne.s32.totalorder %s1033_s9, %s674_s6 }
  0x1a   : > { %584 = vmatprep.subr.bf16.mxu0 %v583_v39  ;;  %v240_v55 = vld [vmem:[%s1074_s1 + $0x140] sm:$0xff]  ;;  %v241_v57 = vld [vmem:[%s1074_s1 + $0x148] sm:$0xff]  ;;  %v227_v59 = vld [vmem:[%s1074_s1 + $0xd8] sm:$0xff]  ;;  %v589_v62 = vpack.c.bf16 %v209_v54, %v208_v53 }
  0x1b   : > { %614 = vmatpush3.bf16.msra.mxu1 %v613_v38  ;;  %v258_v60 = vld [vmem:[%s1074_s1 + $0x1d0] sm:$0xff]  ;;  %v259_v61 = vld [vmem:[%s1074_s1 + $0x1d8] sm:$0xff]  ;;  %v621_v63 = vpack.c.bf16 %v241_v57, %v240_v55  ;;  %v591_v0 = vpack.c.bf16 %v227_v59, %v226_v58  ;;  %v228_v6 = vld [vmem:[%s1074_s1 + $0xe0] sm:$0xff]  ;;  %p676_p12 = pnand %p675_p11, %p802_p5 }
  0x1c   : > { %616 = vmatprep.subr.bf16.mxu1 %v615_v43  ;;  %v210_v1 = vld [vmem:[%s1074_s1 + $0x50] sm:$0xff]  ;;  %v211_v2 = vld [vmem:[%s1074_s1 + $0x58] sm:$0xff]  ;;  %v623_v4 = vpack.c.bf16 %v259_v61, %v258_v60  ;;  %v229_v7 = vld [vmem:[%s1074_s1 + $0xe8] sm:$0xff] }
  0x1d   : > { %586 = vmatpush3.bf16.msra.mxu0 %v585_v48  ;;  %v242_v3 = vld [vmem:[%s1074_s1 + $0x150] sm:$0xff]  ;;  %v243_v5 = vld [vmem:[%s1074_s1 + $0x158] sm:$0xff]  ;;  %v260_v8 = vld [vmem:[%s1074_s1 + $0x1e0] sm:$0xff]  ;;  %v593_v10 = vpack.c.bf16 %v211_v2, %v210_v1  ;;  %v595_v14 = vpack.c.bf16 %v229_v7, %v228_v6  ;;  %p677_p13 = pneg %p676_p12 }
  0x1e   : > { %588 = vmatprep.subr.bf16.mxu0 %v587_v52  ;;  %v261_v9 = vld [vmem:[%s1074_s1 + $0x1e8] sm:$0xff]  ;;  %v212_v11 = vld [vmem:[%s1074_s1 + $0x60] sm:$0xff]  ;;  %v625_v13 = vpack.c.bf16 %v243_v5, %v242_v3  ;;  %v230_v19 = vld [vmem:[%s1074_s1 + $0xf0] sm:$0xff] }
  0x1f   : > { %618 = vmatpush3.bf16.msra.mxu1 %v617_v51  ;;  %v213_v12 = vld [vmem:[%s1074_s1 + $0x68] sm:$0xff]  ;;  %v244_v15 = vld [vmem:[%s1074_s1 + $0x160] sm:$0xff]  ;;  %v627_v18 = vpack.c.bf16 %v261_v9, %v260_v8  ;;  %v231_v20 = vld [vmem:[%s1074_s1 + $0xf8] sm:$0xff] }
  0x20   : > { %620 = vmatprep.subr.bf16.mxu1 %v619_v56  ;;  %v245_v16 = vld [vmem:[%s1074_s1 + $0x168] sm:$0xff]  ;;  %v199_v21 = vld [vmem:[%s972_s30 + $0x18] sm:$0xff]  ;;  %v262_v22 = vld [vmem:[%s1074_s1 + $0x1f0] sm:$0xff]  ;;  %v597_v24 = vpack.c.bf16 %v213_v12, %v212_v11  ;;  %v599_v26 = vpack.c.bf16 %v231_v20, %v230_v19 }
  0x21   : > { %590 = vmatpush3.bf16.msra.mxu0 %v589_v62  ;;  %v197_v17 = vld [vmem:[%s972_s30 + $0x8] sm:$0xff]  ;;  %v263_v23 = vld [vmem:[%s1074_s1 + $0x1f8] sm:$0xff]  ;;  %405 = vmatprep.mubr.f32.mxu1 %v199_v21  ;;  %v629_v25 = vpack.c.bf16 %v245_v16, %v244_v15  ;;  %v214_v27 = vld [vmem:[%s1074_s1 + $0x70] sm:$0xff] }
  0x22   : > { %592 = vmatprep.subr.bf16.mxu0 %v591_v0  ;;  %335 = vmatprep.mubr.f32.mxu0 %v197_v17  ;;  %v215_v28 = vld [vmem:[%s1074_s1 + $0x78] sm:$0xff]  ;;  %v631_v29 = vpack.c.bf16 %v263_v23, %v262_v22  ;;  %v246_v30 = vld [vmem:[%s1074_s1 + $0x170] sm:$0xff]  ;;  %v196_v34 = vld [vmem:[%s972_s30] sm:$0xff] }
  0x23   : > { %622 = vmatpush3.bf16.msra.mxu1 %v621_v63  ;;  %v247_v31 = vld [vmem:[%s1074_s1 + $0x178] sm:$0xff]  ;;  %v601_v32 = vpack.c.bf16 %v215_v28, %v214_v27  ;;  %v198_v35 = vld [vmem:[%s972_s30 + $0x10] sm:$0xff]  ;;  %v495_v37 = vld [vmem:[%s1075_s2] ss:$0 sm:$0xff]  ;;  %s497_s30 = sshll.u32 %s785_s19, 7  ;;  %s738_s19 = smov [#allocation2]  }
  0x24   : > { %624 = vmatprep.subr.bf16.mxu1 %v623_v4  ;;  %v633_v33 = vpack.c.bf16 %v247_v31, %v246_v30  ;;  %v411_v44 = vld [vmem:[%s1076_s3] sm:$0xff]  ;;  %s1031_s12 = scalar_lea.hbm %s1077_s4, %s497_s30  ;;  %s678_s13 = sshll.u32 %s738_s19, 4  ;;  %s679_s13 = int_to_ptr.vmem [resolvable:$false] %s678_s13 }
  0x25   : > { %594 = vmatpush3.bf16.msra.mxu0 %v593_v10  ;;  %s680_s14 = scalar_lea.vmem %s679_s13, 256  ;;  %p681_p0 = scmp.lt.s32.totalorder %s1033_s9, %s679_s13 }
  0x26   : > { %596 = vmatprep.subr.bf16.mxu0 %v595_v14  ;;  %p682_p1 = scmp.lt.s32.totalorder %s680_s14, %s674_s6 }
  0x27   : > { %626 = vmatpush3.bf16.msra.mxu1 %v625_v13 }
  0x28   : > { %628 = vmatprep.subr.bf16.mxu1 %v627_v18  ;;  %p683_p2 = por %p682_p1, %p681_p0 }
  0x29   : > { %598 = vmatpush3.bf16.msra.mxu0 %v597_v24 }
  0x2a   : > { %600 = vmatprep.subr.bf16.mxu0 %v599_v26  ;;  %p684_p3 = pnand %p683_p2, %p677_p13 }
  0x2b   : > { %630 = vmatpush3.bf16.msra.mxu1 %v629_v25 }
  0x2c   : > { %632 = vmatprep.subr.bf16.mxu1 %v631_v29 }
  0x2d   : > { %602 = vmatpush3.bf16.msra.mxu0 %v601_v32 }
  0x2f   : > { %634 = vmatpush3.bf16.msra.mxu1 %v633_v33 }
  0x30   : > { %336 = vmatmul.mubr.f32.vlgmr.msra.gmra.mrb[0].mxu0 %v196_v34 }
  0x32   : > { %406 = vmatmul.mubr.f32.vlgmr.msra.gmra.mrb[0].mxu1 %v198_v35 }
 0x103   : > { %v533_v36 = vpop.f32.mrb[0].mxu0 }
 0x104   : > { %v534_v38 = vpop.f32.mrb[1].mxu0 }
 0x105   : > { %v568_v39 = vpop.f32.mrb[0].mxu1  ;;  %v535_v40 = vadd.f32 %v534_v38, %v533_v36 }
 0x106   : > { %v569_v41 = vpop.f32.mrb[1].mxu1 }
 0x107   : > { %v570_v42 = vadd.f32 %v569_v41, %v568_v39  ;;  %v338_v43 = vadd.f32 %v535_v40, %v495_v37 }
 0x109   : > { %v408_v45 = vadd.f32 %v570_v42, %v338_v43 }
 0x10b   : > { %v412_v46 = vadd.f32 %v411_v44, %v408_v45 }
 0x10d   : > { %414 = vst.msk [vmem:[%s190_s8] sm:$0xff] %vm413_vm0, %v412_v46 }
 0x10e   : > { %687 = shalt.err (!%p684_p3)
}
 0x10f   : > { %s688_s20 = scalar_lea.hbm %s1031_s12, 128  ;;  %s692_s28 = scalar_lea.hbm %s1077_s4, 256 }
 0x110   : > { %p689_p4 = scmp.ne.s32.totalorder %s1031_s12, %s688_s20  ;;  %p693_p9 = scmp.lt.u32.totalorder %s1031_s12, %s1077_s4 }
 0x111   : > { %p694_p10 = scmp.lt.u32.totalorder %s692_s28, %s688_s20  ;;  %p696_p12 = scmp.lt.u32.totalorder %s688_s20, %s1031_s12 }
 0x112   : > { %p690_p7 = pnand %p689_p4, %p802_p5 }
 0x113   : > { %p695_p11 = por %p694_p10, %p693_p9 }
 0x114   : > { %p691_p8 = pneg %p690_p7 }
 0x115   : > { %p697_p13 = por %p696_p12, %p695_p11 }
 0x117   : > { %p698_p0 = pnand %p697_p13, %p691_p8 }
 0x119   : > { %701 = shalt.err (!%p698_p0)
}
 0x11a   : > { %635 = dma.vmem_to_hbm [thread:$0]  (%p802_p5), %s1033_s9, 128, %s1031_s12, %s416_s27  }
 0x11b PF: > { %p641_p1 = scmp.ge.s32.totalorder %s736_s18, 2  ;;  %s441_s7 = sand.u32 1, %s724_s15  }
 0x11c   : > { %s442_s30 = scalar_lea.sflag [#allocation3], %s441_s7 }
 0x11d   : > { %p638_p2 = pnand %p641_p1, %p806_p6 }
 0x11f   : > { %719 = dma.done.wait (!%p638_p2), %s442_s30, 128  }
 0x120   : > { %721 = vsyncadd (!%p638_p2), %s442_s30, 4294967168  ;;  %p14_p3 = scmp.ge.s32.totalorder %s789_s21, 4   ;;  %s1080_s15 = smov %s728_s16 }
 0x121   : > { %s1081_s16 = smov %s732_s17  ;;  %s1082_s17 = smov %s800_s24 }
 0x122   : > { %s1083_s18 = smov %s789_s21  ;;  %16 = sbr.rel (!%p14_p3) target bundleno = 3 (0x3), region = 71 }
 0x129   :  { %447 = vsyncpa [#allocation3], 1 }
 0x12a   :  { %449 = vsyncpa [#allocation3 + $0x1], 1 }

</bundles_post_ra>
